<compile_context>
chip_gen: v6e
topology: v6e:2x2x1
jax: 0.10.0
libtpu: 0.0.40
codegen_flags: <defaults>
</compile_context>

<pallas_src>
import math
from functools import partial

import jax
import jax.numpy as jnp
from jax.experimental import pallas as pl
from jax.experimental.pallas import tpu as pltpu


def attention_pool_kernel(x_ref, pos0_ref, posr_ref, wqkv_ref, bqkv_ref,
                          wkv_ref, bkv_ref, wproj_ref, bproj_ref, o_ref,
                          *, num_heads):
    # One grid step == one batch element.
    x = x_ref[0].astype(jnp.float32)                   # (C, T), T = H*W on lanes
    C, T = x.shape
    ch = C // num_heads
    inv_sqrt_ch = 1.0 / math.sqrt(ch)                  # == scale*scale, folded into q only

    # ---- token construction -------------------------------------------------
    # token 0 = spatial mean (+ pos-emb column 0); tokens 1..T = spatial (+ pos-emb)
    tok0 = jnp.mean(x, axis=1, keepdims=True) + pos0_ref[...]           # (C, 1)
    rest = x + posr_ref[...]                                            # (C, T)

    # ---- projections ---------------------------------------------------------
    # q/k/v of the pooled token (the only query we ever need): (3C,C)@(C,1)
    qkv0 = jnp.dot(wqkv_ref[...], tok0,
                   preferred_element_type=jnp.float32) + bqkv_ref[...]  # (3C, 1)
    q0 = qkv0[0 * C:1 * C, :] * inv_sqrt_ch                             # (C, 1)
    k0 = qkv0[1 * C:2 * C, :]                                           # (C, 1)
    v0 = qkv0[2 * C:3 * C, :]                                           # (C, 1)

    # k/v of the T spatial tokens: one MXU matmul, no transposes
    kv = jnp.dot(wkv_ref[...], rest,
                 preferred_element_type=jnp.float32) + bkv_ref[...]     # (2C, T)
    k_rest = kv[0 * C:1 * C, :]                                         # (C, T)
    v_rest = kv[1 * C:2 * C, :]                                         # (C, T)

    # ---- scores of query 0 against all T+1 keys, per head --------------------
    # contraction dim is only `ch`, so use VPU elementwise mul + per-head segment sum
    s_rest = (q0 * k_rest).reshape(num_heads, ch, T).sum(axis=1)        # (nh, T)
    s0 = (q0 * k0).reshape(num_heads, ch, 1).sum(axis=1)                # (nh, 1)

    # ---- numerically-stable softmax over the T+1 scores ----------------------
    m = jnp.maximum(jnp.max(s_rest, axis=-1, keepdims=True), s0)        # (nh, 1)
    e0 = jnp.exp(s0 - m)                                                # (nh, 1)
    e = jnp.exp(s_rest - m)                                             # (nh, T)
    denom = e0 + jnp.sum(e, axis=-1, keepdims=True)                     # (nh, 1)

    # ---- attention output of token 0: weighted sum of values -----------------
    num = (v_rest.reshape(num_heads, ch, T) * e[:, None, :]).sum(axis=-1, keepdims=True)
    num = num + v0.reshape(num_heads, ch, 1) * e0[:, None, :]           # (nh, ch, 1)
    attn = (num / denom[:, None, :]).reshape(C, 1)                      # (C, 1)

    # ---- output projection (only token 0 survives) ---------------------------
    out = jnp.dot(wproj_ref[...], attn,
                  preferred_element_type=jnp.float32) + bproj_ref[...]  # (Cout, 1)
    o_ref[0] = out.astype(o_ref.dtype)


def attention_pool2d(x, pos, wqkv, bqkv, wproj, bproj, *, num_heads):
    """x: (B,C,H,W); pos: (C, H*W+1); wqkv: (3C,C); bqkv: (3C,);
       wproj: (Cout,C); bproj: (Cout,).  Returns (B, Cout)."""
    B, C, H, W = x.shape
    T = H * W
    assert C % num_heads == 0, "embed_dim must be divisible by num_heads"
    assert pos.shape == (C, T + 1)
    Cout = wproj.shape[0]

    x3 = x.reshape(B, C, T)
    pos0 = pos[:, :1]                       # (C, 1)  pos-emb of the mean token
    posr = pos[:, 1:]                       # (C, T)  pos-emb of spatial tokens
    bqkv_c = bqkv.reshape(3 * C, 1)
    wkv = wqkv[C:, :]                       # (2C, C) rows producing k and v
    bkv = bqkv[C:].reshape(2 * C, 1)
    bproj_c = bproj.reshape(Cout, 1)

    kernel = partial(attention_pool_kernel, num_heads=num_heads)

    out = pl.pallas_call(
        kernel,
        out_shape=jax.ShapeDtypeStruct((B, Cout, 1), x.dtype),
        grid_spec=pltpu.PrefetchScalarGridSpec(
            num_scalar_prefetch=0,
            grid=(B,),
            in_specs=[
                pl.BlockSpec((1, C, T), lambda b: (b, 0, 0)),     # x (per-batch block)
                pl.BlockSpec((C, 1), lambda b: (0, 0)),           # pos col 0 (resident)
                pl.BlockSpec((C, T), lambda b: (0, 0)),           # pos cols 1..T (resident)
                pl.BlockSpec((3 * C, C), lambda b: (0, 0)),       # W_qkv (resident)
                pl.BlockSpec((3 * C, 1), lambda b: (0, 0)),       # b_qkv (resident)
                pl.BlockSpec((2 * C, C), lambda b: (0, 0)),       # W_kv  (resident)
                pl.BlockSpec((2 * C, 1), lambda b: (0, 0)),       # b_kv  (resident)
                pl.BlockSpec((Cout, C), lambda b: (0, 0)),        # W_proj (resident)
                pl.BlockSpec((Cout, 1), lambda b: (0, 0)),        # b_proj (resident)
            ],
            out_specs=pl.BlockSpec((1, Cout, 1), lambda b: (b, 0, 0)),
        ),
        compiler_params=pltpu.CompilerParams(
            dimension_semantics=("parallel",)),
    )(x3, pos0, posr, wqkv, bqkv_c, wkv, bkv, wproj, bproj_c)
    return out[:, :, 0]                     # (B, Cout)


def attention_pool2d_reference(x, pos, wqkv, bqkv, wproj, bproj, *, num_heads):
    """Pure-JAX mirror of the PyTorch AttentionPool2d.forward (full path)."""
    B, C, H, W = x.shape
    T = H * W
    xr = x.reshape(B, C, T).astype(jnp.float32)
    xc = jnp.concatenate([xr.mean(-1, keepdims=True), xr], axis=-1)      # (B, C, T+1)
    xc = xc + pos[None, :, :]
    qkv = jnp.einsum('oc,bct->bot', wqkv, xc) + bqkv.reshape(1, -1, 1)   # (B, 3C, T+1)
    ch = C // num_heads
    L = T + 1
    q, k, v = jnp.split(qkv, 3, axis=1)
    q = q.reshape(B * num_heads, ch, L)
    k = k.reshape(B * num_heads, ch, L)
    v = v.reshape(B * num_heads, ch, L)
    scale = 1.0 / math.sqrt(math.sqrt(ch))
    w = jnp.einsum('bct,bcs->bts', q * scale, k * scale)
    w = jax.nn.softmax(w, axis=-1)
    a = jnp.einsum('bts,bcs->bct', w, v).reshape(B, C, L)
    out = jnp.einsum('oc,bct->bot', wproj, a) + bproj.reshape(1, -1, 1)  # (B, Cout, T+1)
    return out[:, :, 0]                                                  # (B, Cout)


if __name__ == "__main__":
    # Small shapes consistent with the module:
    # AttentionPool2d(spacial_dim=8, embed_dim=32, num_heads_channels=8, output_dim=16)
    B = 2
    spacial_dim = 8
    H = W = spacial_dim
    embed_dim = 32
    num_heads_channels = 8
    num_heads = embed_dim // num_heads_channels          # 4
    output_dim = 16
    T = H * W                                            # 64

    key = jax.random.PRNGKey(0)
    kx, kpos, kqw, kqb, kpw, kpb = jax.random.split(key, 6)

    x = jax.random.normal(kx, (B, embed_dim, H, W), dtype=jnp.float32)
    # positional_embedding: randn(embed_dim, spacial_dim**2 + 1) / embed_dim**0.5
    pos = jax.random.normal(kpos, (embed_dim, T + 1), jnp.float32) / math.sqrt(embed_dim)
    # qkv_proj = Conv1d(C, 3C, 1): weight (3C, C) with kernel dim squeezed, bias (3C,)
    wqkv = 0.1 * jax.random.normal(kqw, (3 * embed_dim, embed_dim), jnp.float32)
    bqkv = 0.1 * jax.random.normal(kqb, (3 * embed_dim,), jnp.float32)
    # c_proj = Conv1d(C, output_dim, 1)
    wproj = 0.1 * jax.random.normal(kpw, (output_dim, embed_dim), jnp.float32)
    bproj = 0.1 * jax.random.normal(kpb, (output_dim,), jnp.float32)

    out = attention_pool2d(x, pos, wqkv, bqkv, wproj, bproj, num_heads=num_heads)
    out = jax.block_until_ready(out)
    assert out.shape == (B, output_dim), out.shape

    ref = attention_pool2d_reference(x, pos, wqkv, bqkv, wproj, bproj, num_heads=num_heads)
    assert jnp.allclose(out, ref, atol=1e-4, rtol=1e-4), \
        f"mismatch vs reference: max err {jnp.max(jnp.abs(out - ref))}"

    print("KERNEL_OK")
</pallas_src>

<mosaic_0001>
module attributes {stable_mosaic.version = 11 : i64} {
  func.func @attention_pool_kernel(%arg0: i32, %arg1: memref<1x32x64xf32, #tpu.memory_space<vmem>>, %arg2: memref<32x1xf32, #tpu.memory_space<vmem>>, %arg3: memref<32x64xf32, #tpu.memory_space<vmem>>, %arg4: memref<96x32xf32, #tpu.memory_space<vmem>>, %arg5: memref<96x1xf32, #tpu.memory_space<vmem>>, %arg6: memref<64x32xf32, #tpu.memory_space<vmem>>, %arg7: memref<64x1xf32, #tpu.memory_space<vmem>>, %arg8: memref<16x32xf32, #tpu.memory_space<vmem>>, %arg9: memref<16x1xf32, #tpu.memory_space<vmem>>, %arg10: memref<1x16x1xf32, #tpu.memory_space<vmem>>) attributes {dimension_semantics = [#tpu.dimension_semantics<parallel>], iteration_bounds = array<i64: 2>, scalar_prefetch = 0 : i64, scratch_operands = 0 : i64, tpu.core_type = #tpu.core_type<tc>, window_params = [{transform_indices = @transform_0, window_bounds = array<i64: 1, 32, 64>}, {pipeline_mode = #tpu.pipeline_mode<synchronous>, transform_indices = @transform_1, window_bounds = array<i64: 32, 1>}, {pipeline_mode = #tpu.pipeline_mode<synchronous>, transform_indices = @transform_2, window_bounds = array<i64: 32, 64>}, {pipeline_mode = #tpu.pipeline_mode<synchronous>, transform_indices = @transform_3, window_bounds = array<i64: 96, 32>}, {pipeline_mode = #tpu.pipeline_mode<synchronous>, transform_indices = @transform_4, window_bounds = array<i64: 96, 1>}, {pipeline_mode = #tpu.pipeline_mode<synchronous>, transform_indices = @transform_5, window_bounds = array<i64: 64, 32>}, {pipeline_mode = #tpu.pipeline_mode<synchronous>, transform_indices = @transform_6, window_bounds = array<i64: 64, 1>}, {pipeline_mode = #tpu.pipeline_mode<synchronous>, transform_indices = @transform_7, window_bounds = array<i64: 16, 32>}, {pipeline_mode = #tpu.pipeline_mode<synchronous>, transform_indices = @transform_8, window_bounds = array<i64: 16, 1>}, {transform_indices = @transform_9, window_bounds = array<i64: 1, 16, 1>}]} {
    %c0 = arith.constant 0 : index
    %c0_0 = arith.constant 0 : index
    %c0_1 = arith.constant 0 : index
    %0 = vector.load %arg1[%c0, %c0_0, %c0_1] : memref<1x32x64xf32, #tpu.memory_space<vmem>>, vector<1x32x64xf32>
    %1 = vector.shape_cast %0 : vector<1x32x64xf32> to vector<32x64xf32>
    %cst = arith.constant dense<0.000000e+00> : vector<32xf32>
    %2 = vector.multi_reduction <add>, %1, %cst [1] : vector<32x64xf32> to vector<32xf32>
    %3 = vector.shape_cast %2 : vector<32xf32> to vector<32x1xf32>
    %cst_2 = arith.constant 6.400000e+01 : f32
    %4 = vector.broadcast %cst_2 : f32 to vector<32x1xf32>
    %5 = arith.divf %3, %4 : vector<32x1xf32>
    %c0_3 = arith.constant 0 : index
    %c0_4 = arith.constant 0 : index
    %6 = vector.load %arg2[%c0_3, %c0_4] : memref<32x1xf32, #tpu.memory_space<vmem>>, vector<32x1xf32>
    %7 = arith.addf %5, %6 : vector<32x1xf32>
    %c0_5 = arith.constant 0 : index
    %c0_6 = arith.constant 0 : index
    %8 = vector.load %arg3[%c0_5, %c0_6] : memref<32x64xf32, #tpu.memory_space<vmem>>, vector<32x64xf32>
    %9 = arith.addf %1, %8 : vector<32x64xf32>
    %c0_7 = arith.constant 0 : index
    %c0_8 = arith.constant 0 : index
    %10 = vector.load %arg4[%c0_7, %c0_8] : memref<96x32xf32, #tpu.memory_space<vmem>>, vector<96x32xf32>
    %cst_9 = arith.constant dense<0.000000e+00> : vector<96x1xf32>
    %11 = tpu.matmul %10, %7, %cst_9 {dimension_numbers = #tpu.dot_dimension_numbers<[1], [0], [0], [1], [0, 0, 1, 1], [], []>} : vector<96x32xf32>, vector<32x1xf32>, vector<96x1xf32> -> vector<96x1xf32>
    %c0_10 = arith.constant 0 : index
    %c0_11 = arith.constant 0 : index
    %12 = vector.load %arg5[%c0_10, %c0_11] : memref<96x1xf32, #tpu.memory_space<vmem>>, vector<96x1xf32>
    %13 = arith.addf %11, %12 : vector<96x1xf32>
    %14 = vector.extract_strided_slice %13 {offsets = [0, 0], sizes = [32, 1], strides = [1, 1]} : vector<96x1xf32> to vector<32x1xf32>
    %cst_12 = arith.constant 0.353553385 : f32
    %15 = vector.broadcast %cst_12 : f32 to vector<32x1xf32>
    %16 = arith.mulf %14, %15 : vector<32x1xf32>
    %17 = vector.extract_strided_slice %13 {offsets = [32, 0], sizes = [32, 1], strides = [1, 1]} : vector<96x1xf32> to vector<32x1xf32>
    %18 = vector.extract_strided_slice %13 {offsets = [64, 0], sizes = [32, 1], strides = [1, 1]} : vector<96x1xf32> to vector<32x1xf32>
    %c0_13 = arith.constant 0 : index
    %c0_14 = arith.constant 0 : index
    %19 = vector.load %arg6[%c0_13, %c0_14] : memref<64x32xf32, #tpu.memory_space<vmem>>, vector<64x32xf32>
    %cst_15 = arith.constant dense<0.000000e+00> : vector<64x64xf32>
    %20 = tpu.matmul %19, %9, %cst_15 {dimension_numbers = #tpu.dot_dimension_numbers<[1], [0], [0], [1], [0, 0, 1, 1], [], []>} : vector<64x32xf32>, vector<32x64xf32>, vector<64x64xf32> -> vector<64x64xf32>
    %c0_16 = arith.constant 0 : index
    %c0_17 = arith.constant 0 : index
    %21 = vector.load %arg7[%c0_16, %c0_17] : memref<64x1xf32, #tpu.memory_space<vmem>>, vector<64x1xf32>
    %22 = vector.broadcast %21 : vector<64x1xf32> to vector<64x64xf32>
    %23 = arith.addf %20, %22 : vector<64x64xf32>
    %24 = vector.extract_strided_slice %23 {offsets = [0, 0], sizes = [32, 64], strides = [1, 1]} : vector<64x64xf32> to vector<32x64xf32>
    %25 = vector.extract_strided_slice %23 {offsets = [32, 0], sizes = [32, 64], strides = [1, 1]} : vector<64x64xf32> to vector<32x64xf32>
    %26 = vector.broadcast %16 : vector<32x1xf32> to vector<32x64xf32>
    %27 = arith.mulf %26, %24 : vector<32x64xf32>
    %28 = vector.shape_cast %27 : vector<32x64xf32> to vector<4x8x64xf32>
    %cst_18 = arith.constant dense<0.000000e+00> : vector<4x64xf32>
    %29 = vector.multi_reduction <add>, %28, %cst_18 [1] : vector<4x8x64xf32> to vector<4x64xf32>
    %30 = arith.mulf %16, %17 : vector<32x1xf32>
    %31 = vector.shape_cast %30 : vector<32x1xf32> to vector<4x8x1xf32>
    %cst_19 = arith.constant dense<0.000000e+00> : vector<4x1xf32>
    %32 = vector.multi_reduction <add>, %31, %cst_19 [1] : vector<4x8x1xf32> to vector<4x1xf32>
    %cst_20 = arith.constant dense<0xFF800000> : vector<4xf32>
    %33 = vector.multi_reduction <maximumf>, %29, %cst_20 [1] : vector<4x64xf32> to vector<4xf32>
    %34 = vector.shape_cast %33 : vector<4xf32> to vector<4x1xf32>
    %35 = arith.maximumf %34, %32 : vector<4x1xf32>
    %36 = arith.subf %32, %35 : vector<4x1xf32>
    %37 = math.exp %36 : vector<4x1xf32>
    %38 = vector.broadcast %35 : vector<4x1xf32> to vector<4x64xf32>
    %39 = arith.subf %29, %38 : vector<4x64xf32>
    %40 = math.exp %39 : vector<4x64xf32>
    %cst_21 = arith.constant dense<0.000000e+00> : vector<4xf32>
    %41 = vector.multi_reduction <add>, %40, %cst_21 [1] : vector<4x64xf32> to vector<4xf32>
    %42 = vector.shape_cast %41 : vector<4xf32> to vector<4x1xf32>
    %43 = arith.addf %37, %42 : vector<4x1xf32>
    %44 = vector.shape_cast %25 : vector<32x64xf32> to vector<4x8x64xf32>
    %45 = vector.shape_cast %40 : vector<4x64xf32> to vector<4x1x64xf32>
    %46 = vector.broadcast %45 : vector<4x1x64xf32> to vector<4x8x64xf32>
    %47 = arith.mulf %44, %46 : vector<4x8x64xf32>
    %cst_22 = arith.constant dense<0.000000e+00> : vector<4x8xf32>
    %48 = vector.multi_reduction <add>, %47, %cst_22 [2] : vector<4x8x64xf32> to vector<4x8xf32>
    %49 = vector.shape_cast %48 : vector<4x8xf32> to vector<4x8x1xf32>
    %50 = vector.shape_cast %18 : vector<32x1xf32> to vector<4x8x1xf32>
    %51 = vector.shape_cast %37 : vector<4x1xf32> to vector<4x1x1xf32>
    %52 = vector.broadcast %51 : vector<4x1x1xf32> to vector<4x8x1xf32>
    %53 = arith.mulf %50, %52 : vector<4x8x1xf32>
    %54 = arith.addf %49, %53 : vector<4x8x1xf32>
    %55 = vector.shape_cast %43 : vector<4x1xf32> to vector<4x1x1xf32>
    %56 = vector.broadcast %55 : vector<4x1x1xf32> to vector<4x8x1xf32>
    %57 = arith.divf %54, %56 : vector<4x8x1xf32>
    %58 = vector.shape_cast %57 : vector<4x8x1xf32> to vector<32x1xf32>
    %c0_23 = arith.constant 0 : index
    %c0_24 = arith.constant 0 : index
    %59 = vector.load %arg8[%c0_23, %c0_24] : memref<16x32xf32, #tpu.memory_space<vmem>>, vector<16x32xf32>
    %cst_25 = arith.constant dense<0.000000e+00> : vector<16x1xf32>
    %60 = tpu.matmul %59, %58, %cst_25 {dimension_numbers = #tpu.dot_dimension_numbers<[1], [0], [0], [1], [0, 0, 1, 1], [], []>} : vector<16x32xf32>, vector<32x1xf32>, vector<16x1xf32> -> vector<16x1xf32>
    %c0_26 = arith.constant 0 : index
    %c0_27 = arith.constant 0 : index
    %61 = vector.load %arg9[%c0_26, %c0_27] : memref<16x1xf32, #tpu.memory_space<vmem>>, vector<16x1xf32>
    %62 = arith.addf %60, %61 : vector<16x1xf32>
    %c0_28 = arith.constant 0 : index
    %c0_29 = arith.constant 0 : index
    %c0_30 = arith.constant 0 : index
    %63 = vector.load %arg10[%c0_28, %c0_29, %c0_30] : memref<1x16x1xf32, #tpu.memory_space<vmem>>, vector<1x16x1xf32>
    %64 = vector.shape_cast %63 : vector<1x16x1xf32> to vector<16x1xf32>
    %65 = vector.shape_cast %62 : vector<16x1xf32> to vector<1x16x1xf32>
    tpu.vector_store %arg10[%c0_28, %c0_29, %c0_30], %65 {strides = array<i32>} : memref<1x16x1xf32, #tpu.memory_space<vmem>>, vector<1x16x1xf32>,
    return
  }
  func.func @transform_0(%arg0: i32) -> (i32, i32, i32) {
    %c0_i32 = arith.constant 0 : i32
    %c0_i32_0 = arith.constant 0 : i32
    %c0_i32_1 = arith.constant 0 : i32
    return %arg0, %c0_i32, %c0_i32_0 : i32, i32, i32
  }
  func.func @transform_1(%arg0: i32) -> (i32, i32) {
    %c0_i32 = arith.constant 0 : i32
    %c0_i32_0 = arith.constant 0 : i32
    %c0_i32_1 = arith.constant 0 : i32
    return %c0_i32, %c0_i32_0 : i32, i32
  }
  func.func @transform_2(%arg0: i32) -> (i32, i32) {
    %c0_i32 = arith.constant 0 : i32
    %c0_i32_0 = arith.constant 0 : i32
    %c0_i32_1 = arith.constant 0 : i32
    return %c0_i32, %c0_i32_0 : i32, i32
  }
  func.func @transform_3(%arg0: i32) -> (i32, i32) {
    %c0_i32 = arith.constant 0 : i32
    %c0_i32_0 = arith.constant 0 : i32
    %c0_i32_1 = arith.constant 0 : i32
    return %c0_i32, %c0_i32_0 : i32, i32
  }
  func.func @transform_4(%arg0: i32) -> (i32, i32) {
    %c0_i32 = arith.constant 0 : i32
    %c0_i32_0 = arith.constant 0 : i32
    %c0_i32_1 = arith.constant 0 : i32
    return %c0_i32, %c0_i32_0 : i32, i32
  }
  func.func @transform_5(%arg0: i32) -> (i32, i32) {
    %c0_i32 = arith.constant 0 : i32
    %c0_i32_0 = arith.constant 0 : i32
    %c0_i32_1 = arith.constant 0 : i32
    return %c0_i32, %c0_i32_0 : i32, i32
  }
  func.func @transform_6(%arg0: i32) -> (i32, i32) {
    %c0_i32 = arith.constant 0 : i32
    %c0_i32_0 = arith.constant 0 : i32
    %c0_i32_1 = arith.constant 0 : i32
    return %c0_i32, %c0_i32_0 : i32, i32
  }
  func.func @transform_7(%arg0: i32) -> (i32, i32) {
    %c0_i32 = arith.constant 0 : i32
    %c0_i32_0 = arith.constant 0 : i32
    %c0_i32_1 = arith.constant 0 : i32
    return %c0_i32, %c0_i32_0 : i32, i32
  }
  func.func @transform_8(%arg0: i32) -> (i32, i32) {
    %c0_i32 = arith.constant 0 : i32
    %c0_i32_0 = arith.constant 0 : i32
    %c0_i32_1 = arith.constant 0 : i32
    return %c0_i32, %c0_i32_0 : i32, i32
  }
  func.func @transform_9(%arg0: i32) -> (i32, i32, i32) {
    %c0_i32 = arith.constant 0 : i32
    %c0_i32_0 = arith.constant 0 : i32
    %c0_i32_1 = arith.constant 0 : i32
    return %arg0, %c0_i32, %c0_i32_0 : i32, i32, i32
  }
}

</mosaic_0001>

<bundles_post_ra>
// kernel: tpu_custom_call.1
= control target key start
LH: loop header
LB: loop body
LE: loop exit
PB: predicated region body
PF: predicated region fallthrough
CT: control target
= control target key end

     0   :  { %s1365_s30 = smov 0   ;;  %s1662_s0 = inlined_call_operand.vmem [shape: f32[2,32,64], index: 0, kind: input, shape index: {}]   ;;  %s1663_s1 = inlined_call_operand.vmem [shape: f32[32,1], index: 1, kind: input, shape index: {}]   ;;  %s1664_s2 = inlined_call_operand.vmem [shape: f32[32,64], index: 2, kind: input, shape index: {}]   ;;  %s1665_s3 = inlined_call_operand.vmem [shape: f32[96,32], index: 3, kind: input, shape index: {}]   ;;  %s1666_s4 = inlined_call_operand.vmem [shape: f32[96,1], index: 4, kind: input, shape index: {}]   ;;  %s1667_s5 = inlined_call_operand.vmem [shape: f32[64,32], index: 5, kind: input, shape index: {}]   ;;  %s1668_s6 = inlined_call_operand.vmem [shape: f32[64,1], index: 6, kind: input, shape index: {}]   ;;  %s1669_s7 = inlined_call_operand.vmem [shape: f32[16,32], index: 7, kind: input, shape index: {}]   ;;  %s1670_s8 = inlined_call_operand.vmem [shape: f32[16,1], index: 8, kind: input, shape index: {}]   ;;  %s1671_s9 = inlined_call_operand.vmem [shape: f32[2,16,1], index: 9, kind: output, shape index: {}]  }
   0x1 LB: > { %s1145_s10 = sadd.s32 4294967295, %s1312_s30   ;;  %p1149_p0 = scmp.ge.s32.totalorder %s1312_s30, 1  ;;  %s1312_s30 = sphi %s1365_s30, %s19_s30  }
   0x2   : > { %p287_p1 = scmp.lt.s32.totalorder %s1312_s30, 3 }
   0x4   : > { %p288_p2 = pnand %p1149_p0, %p287_p1 }
   0x5   : > { %p323_p3 = scmp.lt.s32.totalorder (!%p288_p2), %s1145_s10, 1 }
   0x6   : > { %291 = sbr.rel (%p288_p2) target bundleno = 1175 (0x497), region = 56 }
   0xb   : > { %s1673_s10 = smov (!%p323_p3, %s1145_s10), 1  ;;  %vm337_vm0 = vcmask 523264   ;;  %v371_v8 = vld [vmem:[%s1665_s3] sm:$0xff]  ;;  %vm395_vm1 = vcmask 261120   ;;  %v365_v9 = vld [vmem:[%s1664_s2 + $0x10] sm:$0xff]  ;;  %v364_v10 = vld [vmem:[%s1664_s2 + $0x8] sm:$0xff] }
   0xc   : > { %s1178_s11 = sshll.u32 %s1673_s10, 5  ;;  %1222 = vmatprep.mubr.msk.f32.mxu0 %vm395_vm1, %v371_v8  ;;  %v366_v11 = vld [vmem:[%s1664_s2 + $0x18] sm:$0xff]  ;;  %v561_v12 = vld [vmem:[%s1667_s5] sm:$0xff]  ;;  %v1314_v15 = vmov 0   ;;  %v570_v16 = vld [vmem:[%s1668_s6 + $0x8] sm:$0xff]  ;;  %vm835_vm2 = vcmask 1041409  }
   0xd   : > { %s327_s14 = scalar_lea.vmem %s1662_s0, %s1178_s11  ;;  %1248 = vmatprep.mubr.msk.f32.mxu1 %vm395_vm1, %v561_v12  ;;  %1281 = vset.pattern.permute.xlu1 %v1314_v15  ;;  %v363_v17 = vld [vmem:[%s1664_s2] sm:$0xff]  ;;  %v571_v19 = vld [vmem:[%s1668_s6 + $0x10] sm:$0xff]  ;;  %v572_v21 = vld [vmem:[%s1668_s6 + $0x18] sm:$0xff]  ;;  %vm837_vm3 = vcmask 1042434   ;;  %vm842_vm4 = vcmask 519168   ;;  %vm839_vm5 = vcmask 1043459  }
   0xe   : > { %v336_v0 = vld [vmem:[%s327_s14 + $0x18] sm:$0xff]  ;;  %v335_v1 = vld [vmem:[%s327_s14 + $0x10] sm:$0xff]  ;;  %v334_v2 = vld [vmem:[%s327_s14 + $0x8] sm:$0xff]  ;;  %1280 = vset.pattern.permute.xlu0 %v1314_v15  ;;  %vm802_vm6 = vcmask 7168   ;;  %s1179_s20 = sshll.u32 %s1673_s10, 4 }
   0xf   : > { %v347_v3 = vsel %vm337_vm0, %v336_v0, 0.0  ;;  %v341_v4 = vsel %vm337_vm0, %v334_v2, 0.0  ;;  %v333_v5 = vld [vmem:[%s327_s14] sm:$0xff]  ;;  %v344_v6 = vsel %vm337_vm0, %v335_v1, 0.0  ;;  %v369_v13 = vadd.f32 %v365_v9, %v335_v1  ;;  %v562_v22 = vld [vmem:[%s1667_s5 + $0x8] sm:$0xff]  ;;  %v563_v23 = vld [vmem:[%s1667_s5 + $0x10] sm:$0xff]  ;;  %s332_s25 = scalar_lea.vmem %s1671_s9, %s1179_s20 }
  0x10   : > { %348 = vadd.xlane.f32.xlu0 %v347_v3  ;;  %342 = vadd.xlane.f32.xlu1 %v341_v4  ;;  %v338_v7 = vsel %vm337_vm0, %v333_v5, 0.0  ;;  %v370_v14 = vadd.f32 %v366_v11, %v336_v0  ;;  %v368_v18 = vadd.f32 %v364_v10, %v334_v2  ;;  %v367_v20 = vadd.f32 %v363_v17, %v333_v5  ;;  %v564_v24 = vld [vmem:[%s1667_s5 + $0x18] sm:$0xff]  ;;  %v357_v30 = vld [vmem:[%s1663_s1 + $0x10] sm:$0xff]  ;;  %v356_v36 = vld [vmem:[%s1663_s1 + $0x8] sm:$0xff] }
  0x11   : > { %v358_v27 = vld [vmem:[%s1663_s1 + $0x18] sm:$0xff]  ;;  %v355_v37 = vld [vmem:[%s1663_s1] sm:$0xff]  ;;  %v372_v41 = vld [vmem:[%s1665_s3 + $0x8] sm:$0xff] }
  0x12   : > { %1240 = vmatprep.subr.mxu1 %v370_v14  ;;  %v373_v42 = vld [vmem:[%s1665_s3 + $0x10] sm:$0xff]  ;;  %v374_v43 = vld [vmem:[%s1665_s3 + $0x18] sm:$0xff]  ;;  %v375_v44 = vld [vmem:[%s1665_s3 + $0x20] sm:$0xff] }
  0x13   : > { %1241 = vmatpush3.msra.mxu1 %v370_v14  ;;  %v376_v45 = vld [vmem:[%s1665_s3 + $0x28] sm:$0xff]  ;;  %v377_v46 = vld [vmem:[%s1665_s3 + $0x30] sm:$0xff]  ;;  %v378_v47 = vld [vmem:[%s1665_s3 + $0x38] sm:$0xff] }
  0x14   : > { %345 = vadd.xlane.f32.xlu0 %v344_v6  ;;  %339 = vadd.xlane.f32.xlu1 %v338_v7  ;;  %v569_v48 = vld [vmem:[%s1668_s6] sm:$0xff]  ;;  %v380_v50 = vld [vmem:[%s1665_s3 + $0x48] sm:$0xff]  ;;  %v381_v51 = vld [vmem:[%s1665_s3 + $0x50] sm:$0xff] }
  0x15   : > { %1242 = vmatprep.subr.mxu1 %v369_v13  ;;  %v379_v49 = vld [vmem:[%s1665_s3 + $0x40] sm:$0xff]  ;;  %v382_v52 = vld [vmem:[%s1665_s3 + $0x58] sm:$0xff]  ;;  %v384_v53 = vld [vmem:[%s1666_s4 + $0x8] sm:$0xff] }
  0x16   : > { %1243 = vmatpush3.msra.mxu1 %v369_v13  ;;  %v383_v55 = vld [vmem:[%s1666_s4] sm:$0xff]  ;;  %v385_v61 = vld [vmem:[%s1666_s4 + $0x10] sm:$0xff]  ;;  %v386_v1 = vld [vmem:[%s1666_s4 + $0x18] sm:$0xff] }
  0x17   : > { %1244 = vmatprep.subr.mxu1 %v368_v18  ;;  %v565_v5 = vld [vmem:[%s1667_s5 + $0x20] sm:$0xff]  ;;  %v566_v6 = vld [vmem:[%s1667_s5 + $0x28] sm:$0xff]  ;;  %v567_v7 = vld [vmem:[%s1667_s5 + $0x30] sm:$0xff] }
  0x18   : > { %1245 = vmatpush3.msra.mxu1 %v368_v18  ;;  %v568_v8 = vld [vmem:[%s1667_s5 + $0x38] sm:$0xff] }
  0x19   : > { %1246 = vmatprep.subr.mxu1 %v367_v20 }
  0x1a   : > { %1247 = vmatpush3.msra.mxu1 %v367_v20 }
  0x1b   : > { %1249 = vmatmul.mubr.msk.f32.vlgmr.msra.gmra.mxu1 %vm395_vm1, %v562_v22 }
  0x1c   : > { %1251 = vmatprep.mubr.msk.f32.mxu1 %vm395_vm1, %v563_v23 }
  0x1f   : > { %1252 = vmatmul.mubr.msk.f32.gmra.mxu1 %vm395_vm1, %v564_v24 }
  0x20   : > { %1254 = vmatprep.mubr.msk.f32.mxu1 %vm395_vm1, %v565_v5 }
  0x23   : > { %1255 = vmatmul.mubr.msk.f32.gmra.mxu1 %vm395_vm1, %v566_v6  ;;  %v389_v6 = vld [vmem:[%s1666_s4 + $0x30] sm:$0xff] }
  0x24   : > { %1257 = vmatprep.mubr.msk.f32.mxu1 %vm395_vm1, %v567_v7  ;;  %v388_v7 = vld [vmem:[%s1666_s4 + $0x28] sm:$0xff] }
  0x25   : > { %584 = vperm.xlu1 %1281, %v570_v16  }
  0x27   : > { %1258 = vmatmul.mubr.msk.f32.gmra.mxu1 %vm395_vm1, %v568_v8 }
  0x29   : > { %589 = vperm.xlu1 %1281, %v571_v19  }
  0x2a   : > { %579 = vperm.xlu0 %1280, %v569_v48  }
  0x2d   : > { %594 = vperm.xlu1 %1281, %v572_v21  }
  0x99   : > { %v349_v25 = vpop.xlane.xlu0 %348  ;;  %v343_v26 = vpop.xlane.xlu1 %342 }
  0x9a   : > { %v354_v28 = vmul.f32 0.015625, %v349_v25  ;;  %v352_v34 = vmul.f32 0.015625, %v343_v26 }
  0x9c   : > { %v362_v29 = vadd.f32 %v358_v27, %v354_v28  ;;  %v360_v39 = vadd.f32 %v356_v36, %v352_v34 }
  0x9d   : > { %v346_v31 = vpop.xlane.xlu0 %345  ;;  %v340_v32 = vpop.xlane.xlu1 %339 }
  0x9e   : > { %v353_v33 = vmul.f32 0.015625, %v346_v31  ;;  %1214 = vmatprep.subr.mxu0 %v362_v29  ;;  %v351_v35 = vmul.f32 0.015625, %v340_v32 }
  0x9f   : > { %1215 = vmatpush3.msra.mxu0 %v362_v29 }
  0xa0   : > { %v361_v38 = vadd.f32 %v357_v30, %v353_v33  ;;  %v359_v40 = vadd.f32 %v355_v37, %v351_v35 }
  0xa1   : > { %v585_v9 = vpop.permute.xlu1 %584 }
  0xa2   : > { %1216 = vmatprep.subr.mxu0 %v361_v38 }
  0xa3   : > { %1217 = vmatpush3.msra.mxu0 %v361_v38 }
  0xa4   : > { %1218 = vmatprep.subr.mxu0 %v360_v39 }
  0xa5   : > { %1219 = vmatpush3.msra.mxu0 %v360_v39  ;;  %v590_v10 = vpop.permute.xlu1 %589  ;;  %v580_v14 = vpop.permute.xlu0 %579 }
  0xa6   : > { %1220 = vmatprep.subr.mxu0 %v359_v40 }
  0xa7   : > { %1221 = vmatpush3.msra.mxu0 %v359_v40 }
  0xa8   : > { %1223 = vmatmul.mubr.msk.f32.vlgmr.msra.gmra.mxu0 %vm395_vm1, %v372_v41 }
  0xa9   : > { %1225 = vmatprep.mubr.msk.f32.mxu0 %vm395_vm1, %v373_v42  ;;  %v595_v13 = vpop.permute.xlu1 %594 }
  0xac   : > { %1226 = vmatmul.mubr.msk.f32.gmra.mxu0 %vm395_vm1, %v374_v43 }
  0xad   : > { %1228 = vmatprep.mubr.msk.f32.mxu0 %vm395_vm1, %v375_v44 }
  0xb0   : > { %1229 = vmatmul.mubr.msk.f32.gmra.mxu0 %vm395_vm1, %v376_v45 }
  0xb1   : > { %1231 = vmatprep.mubr.msk.f32.mxu0 %vm395_vm1, %v377_v46 }
  0xb4   : > { %1232 = vmatmul.mubr.msk.f32.gmra.mxu0 %vm395_vm1, %v378_v47 }
  0xb5   : > { %1234 = vmatprep.mubr.msk.f32.mxu0 %vm395_vm1, %v379_v49 }
  0xb8   : > { %1235 = vmatmul.mubr.msk.f32.gmra.mxu0 %vm395_vm1, %v380_v50 }
  0xb9   : > { %1237 = vmatprep.mubr.msk.f32.mxu0 %vm395_vm1, %v381_v51 }
  0xbc   : > { %1238 = vmatmul.mubr.msk.f32.gmra.mxu0 %vm395_vm1, %v382_v52 }
  0xdb   : > { %v1250_v11 = vpop.f32.mrf.mxu1 }
  0xdc   : > { %v713_v15 = vadd.f32 %v1250_v11, %v585_v9  ;;  %v390_v11 = vld [vmem:[%s1666_s4 + $0x38] sm:$0xff] }
  0xdd   : > { %v707_v12 = vpop.f32.mrf.mxu1 }
  0xde   : > { %v708_v19 = vadd.f32 %v707_v12, %v580_v14 }
  0xdf   : > { %v1253_v16 = vpop.f32.mrf.mxu1 }
  0xe0   : > { %v723_v32 = vadd.f32 %v1253_v16, %v595_v13 }
  0xe1   : > { %v717_v21 = vpop.f32.mrf.mxu1 }
  0xe2   : > { %v718_v25 = vadd.f32 %v717_v21, %v590_v10 }
 0x168   : > { %v1224_v54 = vpop.f32.mrf.mxu0 }
 0x169   : > { %v504_v56 = vadd.f32 %v1224_v54, %v384_v53 }
 0x16a   : > { %v498_v57 = vpop.f32.mrf.mxu0 }
 0x16b   : > { %v1489_v58 = vmul.f32 0.35355338, %v504_v56  ;;  %v499_v59 = vadd.f32 %v498_v57, %v383_v55 }
 0x16c   : > { %v1227_v60 = vpop.f32.mrf.mxu0 }
 0x16d   : > { %753 = vperm.xlu1 %1281, %v1489_v58   ;;  %v1495_v63 = vmul.f32 0.35355338, %v499_v59  ;;  %v514_v2 = vadd.f32 %v1227_v60, %v386_v1 }
 0x16e   : > { %v508_v62 = vpop.f32.mrf.mxu0 }
 0x16f   : > { %v509_v0 = vadd.f32 %v508_v62, %v385_v61  ;;  %v1504_v4 = vmul.f32 0.35355338, %v514_v2  ;;  %v387_v2 = vld [vmem:[%s1666_s4 + $0x20] sm:$0xff] }
 0x170   : > { %v1230_v62 = vpop.f32.mrf.mxu0 }
 0x171   : > { %748 = vperm.xlu1 %1281, %v1495_v63   ;;  %v1501_v3 = vmul.f32 0.35355338, %v509_v0  ;;  %v524_v10 = vadd.f32 %v1230_v62, %v388_v7 }
 0x172   : > { %v518_v0 = vpop.f32.mrf.mxu0 }
 0x173   : > { %v519_v8 = vadd.f32 %v518_v0, %v387_v2  ;;  %v799_v14 = vmul.f32 %v1489_v58, %v524_v10 }
 0x174   : > { %v1233_v1 = vpop.f32.mrf.mxu0 }
 0x175   : > { %758 = vperm.xlu1 %1281, %v1501_v3   ;;  %v798_v12 = vmul.f32 %v1495_v63, %v519_v8  ;;  %v923_v8 = vlaneseq }
 0x176   : > { %v528_v5 = vpop.f32.mrf.mxu0 }
 0x177   : > { %v529_v9 = vadd.f32 %v528_v5, %v389_v6  ;;  %v803_v16 = vsel %vm802_vm6, %v798_v12, 0.0  ;;  %v1256_v6 = vpop.f32.mrf.mxu1  ;;  %v924_v10 = vshrl.u32 %v923_v8, 7 }
 0x179   : > { %763 = vperm.xlu1 %1281, %v1504_v4   ;;  %v800_v13 = vmul.f32 %v1501_v3, %v529_v9  ;;  %v727_v9 = vpop.f32.mrf.mxu1 }
 0x1e8   : > { %v754_v17 = vpop.permute.xlu1 %753 }
 0x1e9   : > { %v767_v18 = vmul.f32 %v754_v17, %v713_v15  ;;  %v534_v15 = vadd.f32 %v1233_v1, %v390_v11  ;;  %v817_v17 = vsel %vm802_vm6, %v800_v13, 0.0  ;;  %v1597_v13 = vsub.s32 0, %v924_v10 }
 0x1ea   : > { %v818_v21 = vrot.slane %v817_v17, 4 }
 0x1eb   : > { %v777_v20 = vsel %vm337_vm0, %v767_v18, 0.0  ;;  %v810_v18 = vsel %vm802_vm6, %v799_v14, 0.0 }
 0x1ec   : > { %v778_v22 = vrot.slane %v777_v20, 4  ;;  %v749_v23 = vpop.permute.xlu1 %748 }
 0x1ed   : > { %v766_v24 = vmul.f32 %v749_v23, %v708_v19  ;;  %v801_v19 = vmul.f32 %v1504_v4, %v534_v15 }
 0x1ee   : > { %v779_v27 = vadd.f32 %v778_v22, %v777_v20  ;;  %v804_v20 = vrot.slane %v803_v16, 4  ;;  %v811_v22 = vrot.slane %v810_v18, 4 }
 0x1ef   : > { %v770_v26 = vsel %vm337_vm0, %v766_v24, 0.0  ;;  %v824_v23 = vsel %vm802_vm6, %v801_v19, 0.0  ;;  %v819_v24 = vadd.f32 %v818_v21, %v817_v17 }
 0x1f0   : > { %v771_v28 = vrot.slane %v770_v26, 4  ;;  %v759_v29 = vpop.permute.xlu1 %758  ;;  %v780_v34 = vrot.slane %v779_v27, 2  ;;  %v805_v63 = vadd.f32 %v804_v20, %v803_v16  ;;  %v812_v3 = vadd.f32 %v811_v22, %v810_v18 }
 0x1f1   : > { %v768_v30 = vmul.f32 %v759_v29, %v718_v25  ;;  %v825_v25 = vrot.slane %v824_v23, 4 }
 0x1f2   : > { %v772_v31 = vadd.f32 %v771_v28, %v770_v26  ;;  %v781_v42 = vadd.f32 %v780_v34, %v779_v27  ;;  %v806_v58 = vrot.slane %v805_v63, 2  ;;  %v820_v26 = vrot.slane %v819_v24, 2 }
 0x1f3   : > { %v784_v33 = vsel %vm337_vm0, %v768_v30, 0.0  ;;  %v813_v27 = vrot.slane %v812_v3, 2  ;;  %v826_v28 = vadd.f32 %v825_v25, %v824_v23 }
 0x1f4   : > { %v773_v35 = vrot.slane %v772_v31, 2  ;;  %v785_v36 = vrot.slane %v784_v33, 4  ;;  %v764_v37 = vpop.permute.xlu1 %763  ;;  %v782_v48 = vrot.slane %v781_v42, 1  ;;  %v807_v29 = vadd.f32 %v806_v58, %v805_v63 }
 0x1f5   : > { %v769_v38 = vmul.f32 %v764_v37, %v723_v32  ;;  %v821_v30 = vadd.f32 %v820_v26, %v819_v24  ;;  %v827_v32 = vrot.slane %v826_v28, 2 }
 0x1f6   : > { %v774_v39 = vadd.f32 %v773_v35, %v772_v31  ;;  %v786_v40 = vadd.f32 %v785_v36, %v784_v33  ;;  %v1531_v54 = vadd.f32 %v782_v48, %v781_v42  ;;  %v814_v31 = vadd.f32 %v813_v27, %v812_v3  ;;  %v574_v48 = vld [vmem:[%s1668_s6 + $0x28] sm:$0xff] }
 0x1f7   : > { %v791_v41 = vsel %vm337_vm0, %v769_v38, 0.0  ;;  %v808_v33 = vrot.slane %v807_v29, 1  ;;  %v822_v34 = vrot.slane %v821_v30, 1  ;;  %v828_v35 = vadd.f32 %v827_v32, %v826_v28 }
 0x1f8   : > { %v787_v43 = vrot.slane %v786_v40, 2  ;;  %v792_v44 = vrot.slane %v791_v41, 4  ;;  %v775_v45 = vrot.slane %v774_v39, 1  ;;  %v815_v4 = vrot.slane %v814_v31, 1 }
 0x1f9   : > { %v1563_v36 = vadd.f32 %v808_v33, %v807_v29  ;;  %v1565_v37 = vadd.f32 %v822_v34, %v821_v30 }
 0x1fa   : > { %v788_v46 = vadd.f32 %v787_v43, %v786_v40  ;;  %v793_v47 = vadd.f32 %v792_v44, %v791_v41  ;;  %v1527_v51 = vadd.f32 %v775_v45, %v774_v39  ;;  %v1567_v38 = vadd.f32 %v815_v4, %v814_v31 }
 0x1fb   : > { %v829_v39 = vrot.slane %v828_v35, 1 }
 0x1fc   : > { %v789_v49 = vrot.slane %v788_v46, 1  ;;  %v794_v50 = vrot.slane %v793_v47, 2  ;;  %v836_v57 = vsel %vm835_vm2, %v1531_v54, %v1527_v51  ;;  %v850_v40 = vsel %vm835_vm2, %v1567_v38, %v1563_v36 }
 0x1fd   : > { %v851_v41 = vsel %vm837_vm3, %v1565_v37, %v850_v40  ;;  %v1574_v42 = vadd.f32 %v829_v39, %v828_v35  ;;  %v1003_v39 = vld [vmem:[%s1669_s7] sm:$0xff] }
 0x1fe   : > { %v795_v52 = vadd.f32 %v794_v50, %v793_v47  ;;  %v1529_v53 = vadd.f32 %v789_v49, %v788_v46  ;;  %v576_v46 = vld [vmem:[%s1668_s6 + $0x38] sm:$0xff]  ;;  %v575_v47 = vld [vmem:[%s1668_s6 + $0x30] sm:$0xff]  ;;  %v573_v49 = vld [vmem:[%s1668_s6 + $0x20] sm:$0xff]  ;;  %1268 = vmatprep.mubr.msk.f32.mxu1 %vm395_vm1, %v1003_v39 }
 0x1ff   : > { %v852_v43 = vsel %vm839_vm5, %v1574_v42, %v851_v41 }
 0x200   : > { %v796_v55 = vrot.slane %v795_v52, 1  ;;  %v838_v59 = vsel %vm837_vm3, %v1529_v53, %v836_v57 }
 0x202   : > { %v1533_v56 = vadd.f32 %v796_v55, %v795_v52 }
 0x204   : > { %v840_v60 = vsel %vm839_vm5, %v1533_v56, %v838_v59 }
 0x205   : > { %v843_v61 = vsel %vm842_vm4, %v840_v60, -inf }
 0x206   : > { %844 = vmax.xlane.f32.xlu1 %v843_v61 }
 0x28f   : > { %v845_v44 = vpop.xlane.xlu1 %844 }
 0x290   : > { %v1578_v45 = vmax.f32 %v845_v44, %v852_v43 }
 0x292   : > { %876 = vperm.xlu0 %1280, %v1578_v45   ;;  %v856_v40 = vrot.slane %v1578_v45, 1  ;;  %v857_v41 = vrot.slane %v1578_v45, 2  ;;  %v858_v43 = vrot.slane %v1578_v45, 3 }
 0x294   : > { %v864_v44 = vsub.f32 %v1567_v38, %v856_v40  ;;  %v1006_v40 = vld [vmem:[%s1670_s8 + $0x8] sm:$0xff] }
 0x296   : > { %614 = vperm.xlu0 %1280, %v576_v46   ;;  %v865_v46 = vsub.f32 %v1565_v37, %v857_v41 }
 0x29a   : > { %609 = vperm.xlu0 %1280, %v575_v47   ;;  %v866_v47 = vsub.f32 %v1574_v42, %v858_v43  ;;  %v1005_v43 = vld [vmem:[%s1670_s8] sm:$0xff] }
 0x29e   : > { %604 = vperm.xlu0 %1280, %v574_v48   ;;  %v863_v48 = vsub.f32 %v1563_v36, %v1578_v45 }
 0x2a2   : > { %599 = vperm.xlu0 %1280, %v573_v49   ;;  %v869_v49 = vmul.f32 1.442695, %v864_v44 }
 0x30d   : > { %v877_v50 = vpop.permute.xlu0 %876 }
 0x30e   : > { %v878_v52 = vrot.slane %v877_v50, 1  ;;  %v879_v55 = vrot.slane %v877_v50, 2  ;;  %v880_v57 = vrot.slane %v877_v50, 3  ;;  %v885_v59 = vsub.f32 %v1527_v51, %v877_v50 }
 0x30f   : > { %v871_v50 = vmul.f32 1.442695, %v865_v46 }
 0x310   : > { %v886_v60 = vsub.f32 %v1531_v54, %v878_v52  ;;  %v887_v61 = vsub.f32 %v1529_v53, %v879_v55  ;;  %v888_v62 = vsub.f32 %v1533_v56, %v880_v57  ;;  %v889_v0 = vmul.f32 1.442695, %v885_v59  ;;  %v1259_v54 = vpop.f32.mrf.mxu1 }
 0x311   : > { %v615_v7 = vpop.permute.xlu0 %614  ;;  %v873_v52 = vmul.f32 1.442695, %v866_v47  ;;  %v867_v55 = vmul.f32 1.442695, %v863_v48 }
 0x312   : > { %v891_v1 = vmul.f32 1.442695, %v886_v60  ;;  %v893_v2 = vmul.f32 1.442695, %v887_v61  ;;  %v895_v5 = vmul.f32 1.442695, %v888_v62  ;;  %1282 = vpow2.f32 %v889_v0  ;;  %v737_v16 = vpop.f32.mrf.mxu1  ;;  %v1236_v0 = vpop.f32.mrf.mxu0 }
 0x313   : > { %v743_v15 = vadd.f32 %v1259_v54, %v615_v7 }
 0x314   : > { %1284 = vpow2.f32 %v891_v1  ;;  %v538_v7 = vpop.f32.mrf.mxu0 }
 0x315   : > { %1286 = vpow2.f32 %v893_v2  ;;  %v610_v51 = vpop.permute.xlu0 %609 }
 0x316   : > { %1288 = vpow2.f32 %v895_v5  ;;  %v738_v63 = vadd.f32 %v737_v16, %v610_v51  ;;  %v1239_v51 = vpop.f32.mrf.mxu0 }
 0x317   : > { %1290 = vpow2.f32 %v869_v49 }
 0x318   : > { %1292 = vpow2.f32 %v871_v50 }
 0x319   : > { %v605_v22 = vpop.permute.xlu0 %604  ;;  %1294 = vpow2.f32 %v873_v52 }
 0x31a   : > { %v733_v28 = vadd.f32 %v1256_v6, %v605_v22  ;;  %1296 = vpow2.f32 %v867_v55 }
 0x31d   : > { %v600_v29 = vpop.permute.xlu0 %599 }
 0x31e   : > { %v728_v33 = vadd.f32 %v727_v9, %v600_v29 }
 0x31f   : > { %v1283_v11 = vpop.eup %1282 }
 0x320   : > { %v926_v32 = vrot.slane %v1283_v11, %v1597_v13 }
 0x321   : > { %v1285_v12 = vpop.eup %1284 }
 0x322   : > { %v1287_v53 = vpop.eup %1286  ;;  %v901_v56 = vrot.slane %v1285_v12, 7  ;;  %v930_v27 = vrot.slane %v1285_v12, %v1597_v13  ;;  %v939_v4 = vmul.f32 %v926_v32, %v728_v33  ;;  %v548_v12 = vpop.f32.mrf.mxu0 }
 0x323   : > { %v1289_v14 = vpop.eup %1288  ;;  %v903_v17 = vrot.slane %v1287_v53, 6  ;;  %v934_v21 = vrot.slane %v1287_v53, %v1597_v13  ;;  %v393_v53 = vld [vmem:[%s1666_s4 + $0x50] sm:$0xff] }
 0x324   : > { %v938_v18 = vrot.slane %v1289_v14, %v1597_v13  ;;  %v902_v19 = vsel %vm835_vm2, %v901_v56, %v1283_v11  ;;  %v905_v20 = vrot.slane %v1289_v14, 5  ;;  %v940_v31 = vmul.f32 %v930_v27, %v733_v28  ;;  %v1291_v57 = vpop.eup %1290  ;;  %v394_v11 = vld [vmem:[%s1666_s4 + $0x58] sm:$0xff] }
 0x325   : > { %v904_v23 = vsel %vm837_vm3, %v903_v17, %v902_v19  ;;  %v941_v26 = vmul.f32 %v934_v21, %v738_v63  ;;  %v943_v35 = vsel %vm337_vm0, %v939_v4, 0.0  ;;  %v1293_v60 = vpop.eup %1292  ;;  %v554_v56 = vadd.f32 %v1239_v51, %v394_v11 }
 0x326   : > { %v942_v24 = vmul.f32 %v938_v18, %v743_v15  ;;  %v906_v3 = vsel %vm839_vm5, %v905_v20, %v904_v23  ;;  %v946_v34 = vsel %vm337_vm0, %v940_v31, 0.0  ;;  %v1295_v37 = vpop.eup %1294  ;;  %v392_v15 = vld [vmem:[%s1666_s4 + $0x48] sm:$0xff]  ;;  %v549_v16 = vadd.f32 %v548_v12, %v393_v53  ;;  %v391_v18 = vld [vmem:[%s1666_s4 + $0x40] sm:$0xff] }
 0x327   : > { %v908_v25 = vsel %vm842_vm4, %v906_v3, 0.0  ;;  %v949_v30 = vsel %vm337_vm0, %v941_v26, 0.0  ;;  %v1297_v36 = vpop.eup %1296  ;;  %v970_v14 = vrot.slane %v1295_v37, %v1597_v13  ;;  %v966_v17 = vrot.slane %v1293_v60, %v1597_v13 }
 0x328   : > { %v952_v58 = vsel %vm337_vm0, %v942_v24, 0.0  ;;  %909 = vadd.xlane.f32.xlu0 %v908_v25  ;;  %v544_v20 = vadd.f32 %v1236_v0, %v392_v15  ;;  %v962_v22 = vrot.slane %v1291_v57, %v1597_v13  ;;  %v539_v63 = vadd.f32 %v538_v7, %v391_v18 }
 0x329   : > { %953 = vadd.xlane.f32.xlu1 %v952_v58  ;;  %v974_v21 = vmul.f32 %v970_v14, %v554_v56  ;;  %v973_v3 = vmul.f32 %v966_v17, %v549_v16  ;;  %v958_v25 = vrot.slane %v1297_v36, %v1597_v13 }
 0x32a   : > { %v972_v27 = vmul.f32 %v962_v22, %v544_v20 }
 0x32b   : > { %v971_v33 = vmul.f32 %v958_v25, %v539_v63 }
 0x32d   : > { %950 = vadd.xlane.f32.xlu1 %v949_v30 }
 0x331   : > { %947 = vadd.xlane.f32.xlu1 %v946_v34 }
 0x335   : > { %944 = vadd.xlane.f32.xlu1 %v943_v35 }
 0x3b1   : > { %v910_v59 = vpop.xlane.xlu0 %909 }
 0x3b2   : > { %v912_v61 = vrot.slane %v910_v59, 1  ;;  %v913_v38 = vrot.slane %v910_v59, 2  ;;  %v914_v62 = vrot.slane %v910_v59, 3  ;;  %v919_v45 = vadd.f32 %v1297_v36, %v910_v59  ;;  %v954_v8 = vpop.xlane.xlu1 %953 }
 0x3b3   : > { %v978_v24 = vadd.f32 %v974_v21, %v954_v8 }
 0x3b4   : > { %v920_v42 = vadd.f32 %v1291_v57, %v912_v61  ;;  %v921_v1 = vadd.f32 %v1293_v60, %v913_v38  ;;  %v922_v2 = vadd.f32 %v1295_v37, %v914_v62  ;;  %v982_v10 = vrot.slane %v919_v45, %v1597_v13 }
 0x3b6   : > { %v990_v5 = vrot.slane %v921_v1, %v1597_v13  ;;  %v994_v6 = vrot.slane %v922_v2, %v1597_v13  ;;  %v986_v9 = vrot.slane %v920_v42, %v1597_v13  ;;  %v951_v54 = vpop.xlane.xlu1 %950  ;;  %v1004_v13 = vld [vmem:[%s1669_s7 + $0x8] sm:$0xff] }
 0x3b7   : > { %v977_v26 = vadd.f32 %v973_v3, %v951_v54 }
 0x3b8   : > { %1298 = vrcp.f32 %v990_v5 }
 0x3b9   : > { %1300 = vrcp.f32 %v994_v6 }
 0x3ba   : > { %1302 = vrcp.f32 %v986_v9  ;;  %v948_v19 = vpop.xlane.xlu1 %947 }
 0x3bb   : > { %1304 = vrcp.f32 %v982_v10  ;;  %v976_v32 = vadd.f32 %v972_v27, %v948_v19 }
 0x3be   : > { %v945_v30 = vpop.xlane.xlu1 %944 }
 0x3bf   : > { %v975_v35 = vadd.f32 %v971_v33, %v945_v30 }
 0x3c5   : > { %v1299_v23 = vpop.eup %1298 }
 0x3c6   : > { %v1301_v58 = vpop.eup %1300  ;;  %v1000_v31 = vmul.f32 %v1299_v23, %v977_v26 }
 0x3c7   : > { %v1002_v28 = vmul.f32 %v1301_v58, %v978_v24  ;;  %v1303_v29 = vpop.eup %1302 }
 0x3c8   : > { %v1305_v34 = vpop.eup %1304  ;;  %v998_v4 = vmul.f32 %v1303_v29, %v976_v32 }
 0x3c9   : > { %1260 = vmatprep.subr.mxu1 %v1002_v28  ;;  %v996_v39 = vmul.f32 %v1305_v34, %v975_v35 }
 0x3ca   : > { %1261 = vmatpush3.msra.mxu1 %v1002_v28 }
 0x3cb   : > { %1262 = vmatprep.subr.mxu1 %v1000_v31 }
 0x3cc   : > { %1263 = vmatpush3.msra.mxu1 %v1000_v31 }
 0x3cd   : > { %1264 = vmatprep.subr.mxu1 %v998_v4 }
 0x3ce   : > { %1265 = vmatpush3.msra.mxu1 %v998_v4 }
 0x3cf   : > { %1266 = vmatprep.subr.mxu1 %v996_v39 }
 0x3d0   : > { %1267 = vmatpush3.msra.mxu1 %v996_v39 }
 0x3d1   : > { %1269 = vmatmul.mubr.msk.f32.vlgmr.msra.gmra.mxu1 %vm395_vm1, %v1004_v13 }
 0x491   : > { %v1270_v41 = vpop.f32.mrf.mxu1 }
 0x492   : > { %v1085_v44 = vadd.f32 %v1270_v41, %v1006_v40 }
 0x493   : > { %v1079_v46 = vpop.f32.mrf.mxu1 }
 0x494   : > { %1089 = vst.msk [vmem:[%s332_s25 + $0x8] sm:$0xff] %vm802_vm6, %v1085_v44  ;;  %v1080_v47 = vadd.f32 %v1079_v46, %v1005_v43 }
 0x496   : > { %1088 = vst.msk [vmem:[%s332_s25] sm:$0xff] %vm802_vm6, %v1080_v47 }
 0x497 PF: > { %s19_s30 = sadd.s32 1, %s1312_s30  }
 0x498   : > { %p16_p4 = scmp.ge.s32.totalorder %s19_s30, 4  }
 0x49a   :  { %18 = sbr.rel (!%p16_p4) target bundleno = 1 (0x1), region = 86 }

</bundles_post_ra>
